<compile_context>
chip_gen: v6e
topology: v6e:2x2x1
jax: 0.10.0
libtpu: 0.0.40
codegen_flags: <defaults>
</compile_context>

<pallas_src>
import functools

import jax
import jax.numpy as jnp
import numpy as np
from jax import lax
from jax.experimental import pallas as pl
from jax.experimental.pallas import tpu as pltpu


def repblock_kernel(xf_ref, w_ref, b_ref, o_ref, *, H, W):
    """One batch element per grid step.

    xf_ref: (1, Cin, (H+2)*(W+2) + 2)  zero-padded input, spatial flattened (lane-dense)
    w_ref : (Cout, 9*Cin)              re-parameterized, BN-folded 3x3 weights (1x1 in center tap)
    b_ref : (Cout, 1)                  combined BN bias of both branches
    o_ref : (1, Cout, H*(W+2))         output in padded-width flat layout
    """
    Wp = W + 2
    M = H * Wp

    xf = xf_ref[0]  # (Cin, Hp*Wp + 2)

    # Transposed im2col: each of the 9 taps is a flat lane-slice of the flattened
    # padded image (1D shift = dy*Wp + dx), stacked along the contraction axis.
    # Output positions with x in {W, W+1} are garbage and dropped in the wrapper.
    cols = []
    for dy in range(3):
        for dx in range(3):
            s = dy * Wp + dx
            cols.append(xf[:, s:s + M])
    x_col = jnp.concatenate(cols, axis=0)  # (9*Cin, M)

    # Single MXU matmul with the long spatial axis (M=288) on lanes.
    acc = jnp.dot(w_ref[...], x_col, preferred_element_type=jnp.float32)  # (Cout, M)
    acc = acc + b_ref[...]               # (Cout, 1) broadcasts over lanes
    o_ref[0] = jnp.maximum(acc, 0.0).astype(o_ref.dtype)   # nn.ReLU (active=True)


def repblock_forward(x_nchw, w_rep_hwio, bias):
    """x_nchw: (N, Cin, H, W) float32 -> (N, Cout, H, W) float32 (NCHW, like PyTorch)."""
    N, Cin, H, W = x_nchw.shape
    Cout = w_rep_hwio.shape[-1]
    Hp, Wp = H + 2, W + 2
    M = H * Wp                      # flat output length per image (padded-width rows)
    L = Hp * Wp + 2                 # flat input length (+2 so the largest tap shift stays in bounds)

    # Glue: spatial zero-pad, flatten spatial to the lane axis, +2 tail pad.
    xp = jnp.pad(x_nchw, ((0, 0), (0, 0), (1, 1), (1, 1)))
    xf = jnp.pad(xp.reshape(N, Cin, Hp * Wp), ((0, 0), (0, 0), (0, 2)))

    # Weight as (Cout, 9*Cin): column index = (dy*3 + dx)*Cin + c.
    w_col = jnp.transpose(w_rep_hwio, (3, 0, 1, 2)).reshape(Cout, 9 * Cin)
    b2 = bias.reshape(Cout, 1).astype(jnp.float32)

    out_flat = pl.pallas_call(
        functools.partial(repblock_kernel, H=H, W=W),
        out_shape=jax.ShapeDtypeStruct((N, Cout, M), x_nchw.dtype),
        grid_spec=pltpu.PrefetchScalarGridSpec(
            num_scalar_prefetch=0,
            grid=(N,),
            in_specs=[
                pl.BlockSpec((1, Cin, L), lambda n: (n, 0, 0)),
                pl.BlockSpec((Cout, 9 * Cin), lambda n: (0, 0)),
                pl.BlockSpec((Cout, 1), lambda n: (0, 0)),
            ],
            out_specs=pl.BlockSpec((1, Cout, M), lambda n: (n, 0, 0)),
        ),
        compiler_params=pltpu.CompilerParams(
            dimension_semantics=("parallel",)),
    )(xf, w_col, b2)

    # Layout fixup in glue: drop the two padded columns of each row -> NCHW output.
    return out_flat.reshape(N, Cout, H, Wp)[:, :, :, :W]


def fold_bn(w_hwio, gamma, beta, mean, var, eps=1e-5):
    """Fold eval-mode BatchNorm2d into conv weight (HWIO) + per-Cout bias."""
    scale = gamma / jnp.sqrt(var + eps)          # (Cout,)
    w_f = w_hwio * scale                         # broadcast over last (Cout) dim
    b_f = beta - mean * scale
    return w_f.astype(jnp.float32), b_f.astype(jnp.float32)


if __name__ == "__main__":
    # --- deterministic parameters / inputs --------------------------------
    N, Cin, H, W = 2, 4, 16, 16
    Cout = 8
    key = jax.random.PRNGKey(0)
    k_x, k_w3, k_w1, k_m3, k_m1 = jax.random.split(key, 5)

    # input, PyTorch-style NCHW
    x_nchw = jax.random.normal(k_x, (N, Cin, H, W), dtype=jnp.float32)

    # conv weights in PyTorch OIHW layout, no bias (bias=False in conv_bn)
    w3_oihw = 0.1 * jax.random.normal(k_w3, (Cout, Cin, 3, 3), dtype=jnp.float32)
    w1_oihw = 0.1 * jax.random.normal(k_w1, (Cout, Cin, 1, 1), dtype=jnp.float32)

    # BatchNorm2d params (eval-mode running stats), deterministic
    eps = 1e-5
    gamma3 = 1.0 + 0.05 * jnp.arange(Cout, dtype=jnp.float32)
    beta3 = 0.01 * jnp.arange(Cout, dtype=jnp.float32)
    mean3 = 0.1 * jax.random.normal(k_m3, (Cout,), dtype=jnp.float32)
    var3 = 0.5 + jnp.abs(0.2 * jnp.arange(Cout, dtype=jnp.float32))

    gamma1 = 1.0 - 0.03 * jnp.arange(Cout, dtype=jnp.float32)
    beta1 = -0.02 * jnp.arange(Cout, dtype=jnp.float32)
    mean1 = 0.1 * jax.random.normal(k_m1, (Cout,), dtype=jnp.float32)
    var1 = 0.8 + jnp.abs(0.1 * jnp.arange(Cout, dtype=jnp.float32))

    # --- glue: layout conversion + BN folding + RepVGG reparameterization --
    w3_hwio = jnp.transpose(w3_oihw, (2, 3, 1, 0))          # (3,3,Cin,Cout)
    w1_hwio = jnp.transpose(w1_oihw, (2, 3, 1, 0))          # (1,1,Cin,Cout)

    w3_f, b3 = fold_bn(w3_hwio, gamma3, beta3, mean3, var3, eps)
    w1_f4, b1 = fold_bn(w1_hwio, gamma1, beta1, mean1, var1, eps)
    w_rep = w3_f.at[1, 1].add(w1_f4[0, 0])                  # 1x1 branch -> center tap
    bias = b3 + b1                                          # (Cout,)

    # --- run Pallas kernel -------------------------------------------------
    out = repblock_forward(x_nchw, w_rep, bias)
    out = jax.block_until_ready(out)

    # --- pure-JAX reference (unfolded conv + eval BN + add + ReLU, NCHW) ---
    dn = ("NCHW", "OIHW", "NCHW")

    def bn_nchw(y, gamma, beta, mean, var):
        rs = lambda v: v.reshape(1, -1, 1, 1)
        return (y - rs(mean)) / jnp.sqrt(rs(var) + eps) * rs(gamma) + rs(beta)

    y3 = lax.conv_general_dilated(x_nchw, w3_oihw, (1, 1), ((1, 1), (1, 1)),
                                  dimension_numbers=dn)
    y3 = bn_nchw(y3, gamma3, beta3, mean3, var3)
    y1 = lax.conv_general_dilated(x_nchw, w1_oihw, (1, 1), ((0, 0), (0, 0)),
                                  dimension_numbers=dn)
    y1 = bn_nchw(y1, gamma1, beta1, mean1, var1)
    ref = jnp.maximum(y3 + y1, 0.0)

    np.testing.assert_allclose(np.asarray(out), np.asarray(ref),
                               rtol=1e-4, atol=1e-4)
    print("KERNEL_OK")
</pallas_src>

<mosaic_0001>
module attributes {stable_mosaic.version = 11 : i64} {
  func.func @repblock_kernel(%arg0: i32, %arg1: memref<1x4x326xf32, #tpu.memory_space<vmem>>, %arg2: memref<8x36xf32, #tpu.memory_space<vmem>>, %arg3: memref<8x1xf32, #tpu.memory_space<vmem>>, %arg4: memref<1x8x288xf32, #tpu.memory_space<vmem>>) attributes {dimension_semantics = [#tpu.dimension_semantics<parallel>], iteration_bounds = array<i64: 2>, scalar_prefetch = 0 : i64, scratch_operands = 0 : i64, tpu.core_type = #tpu.core_type<tc>, window_params = [{transform_indices = @transform_0, window_bounds = array<i64: 1, 4, 326>}, {pipeline_mode = #tpu.pipeline_mode<synchronous>, transform_indices = @transform_1, window_bounds = array<i64: 8, 36>}, {pipeline_mode = #tpu.pipeline_mode<synchronous>, transform_indices = @transform_2, window_bounds = array<i64: 8, 1>}, {transform_indices = @transform_3, window_bounds = array<i64: 1, 8, 288>}]} {
    %c0 = arith.constant 0 : index
    %c0_0 = arith.constant 0 : index
    %c0_1 = arith.constant 0 : index
    %0 = vector.load %arg1[%c0, %c0_0, %c0_1] : memref<1x4x326xf32, #tpu.memory_space<vmem>>, vector<1x4x326xf32>
    %1 = vector.shape_cast %0 : vector<1x4x326xf32> to vector<4x326xf32>
    %2 = vector.extract_strided_slice %1 {offsets = [0, 0], sizes = [4, 288], strides = [1, 1]} : vector<4x326xf32> to vector<4x288xf32>
    %3 = vector.extract_strided_slice %1 {offsets = [0, 1], sizes = [4, 288], strides = [1, 1]} : vector<4x326xf32> to vector<4x288xf32>
    %4 = vector.extract_strided_slice %1 {offsets = [0, 2], sizes = [4, 288], strides = [1, 1]} : vector<4x326xf32> to vector<4x288xf32>
    %5 = vector.extract_strided_slice %1 {offsets = [0, 18], sizes = [4, 288], strides = [1, 1]} : vector<4x326xf32> to vector<4x288xf32>
    %6 = vector.extract_strided_slice %1 {offsets = [0, 19], sizes = [4, 288], strides = [1, 1]} : vector<4x326xf32> to vector<4x288xf32>
    %7 = vector.extract_strided_slice %1 {offsets = [0, 20], sizes = [4, 288], strides = [1, 1]} : vector<4x326xf32> to vector<4x288xf32>
    %8 = vector.extract_strided_slice %1 {offsets = [0, 36], sizes = [4, 288], strides = [1, 1]} : vector<4x326xf32> to vector<4x288xf32>
    %9 = vector.extract_strided_slice %1 {offsets = [0, 37], sizes = [4, 288], strides = [1, 1]} : vector<4x326xf32> to vector<4x288xf32>
    %10 = vector.extract_strided_slice %1 {offsets = [0, 38], sizes = [4, 288], strides = [1, 1]} : vector<4x326xf32> to vector<4x288xf32>
    %11 = tpu.concatenate %2, %3, %4, %5, %6, %7, %8, %9, %10 in 0 : vector<4x288xf32>, vector<4x288xf32>, vector<4x288xf32>, vector<4x288xf32>, vector<4x288xf32>, vector<4x288xf32>, vector<4x288xf32>, vector<4x288xf32>, vector<4x288xf32> -> vector<36x288xf32>
    %c0_2 = arith.constant 0 : index
    %c0_3 = arith.constant 0 : index
    %12 = vector.load %arg2[%c0_2, %c0_3] : memref<8x36xf32, #tpu.memory_space<vmem>>, vector<8x36xf32>
    %cst = arith.constant dense<0.000000e+00> : vector<8x288xf32>
    %13 = tpu.matmul %12, %11, %cst {dimension_numbers = #tpu.dot_dimension_numbers<[1], [0], [0], [1], [0, 0, 1, 1], [], []>} : vector<8x36xf32>, vector<36x288xf32>, vector<8x288xf32> -> vector<8x288xf32>
    %c0_4 = arith.constant 0 : index
    %c0_5 = arith.constant 0 : index
    %14 = vector.load %arg3[%c0_4, %c0_5] : memref<8x1xf32, #tpu.memory_space<vmem>>, vector<8x1xf32>
    %15 = vector.broadcast %14 : vector<8x1xf32> to vector<8x288xf32>
    %16 = arith.addf %13, %15 : vector<8x288xf32>
    %cst_6 = arith.constant 0.000000e+00 : f32
    %17 = vector.broadcast %cst_6 : f32 to vector<8x288xf32>
    %18 = arith.maximumf %16, %17 : vector<8x288xf32>
    %c0_7 = arith.constant 0 : index
    %c0_8 = arith.constant 0 : index
    %c0_9 = arith.constant 0 : index
    %19 = vector.load %arg4[%c0_7, %c0_8, %c0_9] : memref<1x8x288xf32, #tpu.memory_space<vmem>>, vector<1x8x288xf32>
    %20 = vector.shape_cast %19 : vector<1x8x288xf32> to vector<8x288xf32>
    %21 = vector.shape_cast %18 : vector<8x288xf32> to vector<1x8x288xf32>
    tpu.vector_store %arg4[%c0_7, %c0_8, %c0_9], %21 {strides = array<i32>} : memref<1x8x288xf32, #tpu.memory_space<vmem>>, vector<1x8x288xf32>,
    return
  }
  func.func @transform_0(%arg0: i32) -> (i32, i32, i32) {
    %c0_i32 = arith.constant 0 : i32
    %c0_i32_0 = arith.constant 0 : i32
    %c0_i32_1 = arith.constant 0 : i32
    return %arg0, %c0_i32, %c0_i32_0 : i32, i32, i32
  }
  func.func @transform_1(%arg0: i32) -> (i32, i32) {
    %c0_i32 = arith.constant 0 : i32
    %c0_i32_0 = arith.constant 0 : i32
    %c0_i32_1 = arith.constant 0 : i32
    return %c0_i32, %c0_i32_0 : i32, i32
  }
  func.func @transform_2(%arg0: i32) -> (i32, i32) {
    %c0_i32 = arith.constant 0 : i32
    %c0_i32_0 = arith.constant 0 : i32
    %c0_i32_1 = arith.constant 0 : i32
    return %c0_i32, %c0_i32_0 : i32, i32
  }
  func.func @transform_3(%arg0: i32) -> (i32, i32, i32) {
    %c0_i32 = arith.constant 0 : i32
    %c0_i32_0 = arith.constant 0 : i32
    %c0_i32_1 = arith.constant 0 : i32
    return %arg0, %c0_i32, %c0_i32_0 : i32, i32, i32
  }
}

</mosaic_0001>

<bundles_post_ra>
// kernel: tpu_custom_call.1
= control target key start
LH: loop header
LB: loop body
LE: loop exit
PB: predicated region body
PF: predicated region fallthrough
CT: control target
= control target key end

     0   :  { %8 = vsyncpa [#allocation3], 0  ;;  %s967_s0 = inlined_call_operand.hbm [shape: f32[2,4,326], index: 0, kind: input, shape index: {}]   ;;  %s968_s1 = inlined_call_operand.vmem [shape: f32[8,36], index: 1, kind: input, shape index: {}]   ;;  %s969_s2 = inlined_call_operand.vmem [shape: f32[8,1], index: 2, kind: input, shape index: {}]   ;;  %s970_s3 = inlined_call_operand.hbm [shape: f32[2,8,288], index: 3, kind: output, shape index: {}]  }
   0x1   :  { %10 = vsyncpa [#allocation3 + $0x1], 0 }
   0x2   :  { %11 = vsyncpa [#allocation4], 0 }
   0x3   :  { %13 = vsyncpa [#allocation4 + $0x1], 0  ;;  %s776_s12 = smov 0   ;;  %s778_s13 = smov 0  }
   0x4   :  { %s780_s14 = smov 0   ;;  %s782_s15 = smov 0  }
   0x5 LB: > { %s797_s16 = sadd.s32 4294967295, %s741_s15   ;;  %s551_s17 = sadd.s32 4294967294, %s741_s15   ;;  %s741_s15 = sphi %s782_s15, %s986_s15   ;;  %s737_s14 = sphi %s780_s14, %s985_s14   ;;  %s733_s13 = sphi %s778_s13, %s984_s13   ;;  %s729_s12 = sphi %s776_s12, %s983_s12  }
   0x6   : > { %s801_s18 = sadd.s32 1, %s741_s15   ;;  %s26_s19 = sadd.s32 1, %s737_s14 }
   0x7   : > { %s23_s20 = ssub.s32 %s741_s15, %s801_s18  ;;  %p33_p0 = scmp.ne.s32.totalorder %s737_s14, %s733_s13 }
   0x8   : > { %p24_p1 = scmp.eq.s32.totalorder %s23_s20, 0  ;;  %p34_p2 = scmp.eq.s32.totalorder %s741_s15, 0 }
   0x9   : > { %p39_p3 = scmp.ne.s32.totalorder %s733_s13, %s729_s12  ;;  %p40_p4 = scmp.eq.s32.totalorder %s797_s16, 0 }
   0xa   : > { %s813_s21 = scalar_select %p24_p1, %s737_s14, %s26_s19  }
   0xb   : > { %p35_p5 = por %p34_p2, %p33_p0  ;;  %p815_p6 = por %p40_p4, %p39_p3 }
   0xc   : > { %p105_p7 = scmp.eq.s32.totalorder %s797_s16, 1  ;;  %p111_p8 = scmp.eq.s32.totalorder %s551_s17, 1 }
   0xd   : > { %s973_s22 = scalar_select %p815_p6, 1, 0 }
   0xe   : > { %p600_p10 = scmp.lt.s32.totalorder %s741_s15, 2  ;;  %p822_p11 = por %p105_p7, %p33_p0 }
   0xf   : > { %p826_p12 = por %p111_p8, %p39_p3  ;;  %s137_s25 = sand.u32 1, %s737_s14  }
  0x10   : > { %s974_s23 = scalar_select %p822_p11, 1, 0 }
  0x11   : > { %s975_s24 = scalar_select %p826_p12, 1, 0 }
  0x12   : > { %s584_s26 = smul.u32 192, %s741_s15  ;;  %p837_p13 = pnand %p600_p10, %p35_p5 }
  0x13   : > { %s583_s27 = smul.u32 12, %s137_s25  ;;  %s138_s7 = scalar_lea.sflag [#allocation3], %s137_s25 }
  0x14   : > { %s835_s30 = scalar_lea.hbm %s967_s0, %s584_s26  ;;  %p651_p3 = pneg %p837_p13 }
  0x15   : > { %s141_s5 = scalar_lea.vmem [#allocation2], %s583_s27  ;;  %s649_s8 = scalar_lea.hbm %s835_s30, 192 }
  0x16   : > { %s149_s6 = sshll.u32 %s141_s5, 4  ;;  %p650_p2 = scmp.ne.s32.totalorder %s835_s30, %s649_s8  ;;  %s150_s6 = int_to_ptr.vmem [resolvable:$true] %s149_s6 }
  0x17   : > { %s654_s11 = scalar_lea.hbm %s967_s0, 384  ;;  %p655_p5 = scmp.lt.s32.totalorder %s835_s30, %s967_s0 }
  0x18   : > { %p652_p4 = pnand %p651_p3, %p650_p2  ;;  %p656_p8 = scmp.lt.s32.totalorder %s654_s11, %s649_s8 }
  0x1a   : > { %p653_p7 = pneg %p652_p4  ;;  %p657_p10 = por %p656_p8, %p655_p5 }
  0x1c   : > { %p658_p9 = pnand %p657_p10, %p653_p7 }
  0x1e   : > { %661 = shalt.err (!%p658_p9)
}
  0x1f   : > { %s662_s20 = scalar_lea.vmem %s150_s6, 192  ;;  %s743_s25 = smov [#allocation2]  }
  0x20   : > { %p663_p0 = scmp.ne.s32.totalorder %s150_s6, %s662_s20  ;;  %s667_s26 = sshll.u32 %s743_s25, 4  ;;  %s668_s26 = int_to_ptr.vmem [resolvable:$false] %s667_s26 }
  0x21   : > { %s669_s27 = scalar_lea.vmem %s668_s26, 384  ;;  %p670_p2 = scmp.lt.s32.totalorder %s150_s6, %s668_s26 }
  0x22   : > { %p665_p1 = pnand %p663_p0, %p651_p3  ;;  %p671_p4 = scmp.lt.s32.totalorder %s669_s27, %s662_s20 }
  0x24   : > { %p666_p12 = pneg %p665_p1  ;;  %p672_p11 = por %p671_p4, %p670_p2 }
  0x26   : > { %p673_p6 = pnand %p672_p11, %p666_p12 }
  0x28   : > { %676 = shalt.err (!%p673_p6)
}
  0x29   : > { %595 = dma.hbm_to_vmem [thread:$0]  (!%p837_p13), %s835_s30, 192, %s150_s6, %s138_s7  }
  0x2a   : > { %p977_p9 = scmp.lt.s32.totalorder %s741_s15, 3  ;;  %p978_p7 = scmp.ge.s32.totalorder %s741_s15, 1 }
  0x2c   : > { %p155_p5 = pnand %p978_p7, %p977_p9 }
  0x2d   : > { %s862_s28 = sand.u32 (!%p155_p5), 1, %s733_s13   ;;  %p979_p6 = scmp.ne.s32.totalorder (!%p155_p5), %s973_s22, 0 }
  0x2e   : > { %158 = sbr.rel (%p155_p5) target bundleno = 429 (0x1ad), region = 32  ;;  %s161_s5 = scalar_lea.sflag (!%p155_p5), [#allocation3], %s862_s28 }
  0x2f   : > { %s585_s29 = smul.u32 (!%p155_p5), 12, %s862_s28 }
  0x31   : > { %s164_s8 = scalar_lea.vmem (!%p155_p5), [#allocation2], %s585_s29 }
  0x33   : > { %720 = dma.done.wait (%p979_p6), %s161_s5, 192  }
  0x34   : > { %722 = vsyncadd (%p979_p6), %s161_s5, 4294967104  ;;  %v744_v0 = vmov 0.0   ;;  %v872_v1 = vld [vmem:[%s164_s8 + $0x8] sm:$0xf]  ;;  %v874_v2 = vld [vmem:[%s164_s8] sm:$0xff]  ;;  %s745_s30 = smov 92  }
  0x35   : > { %570 = vmatprep.subr.mxu1 %v744_v0  ;;  %382 = vmatprep.mubr.f32.mxu0 %v744_v0  ;;  %s746_s4 = smov 90   ;;  %v880_v3 = vcombine.high %v874_v2, %v874_v2  ;;  %s747_s22 = smov 91   ;;  %v194_v4 = vcombine.low %v872_v1, %v872_v1  ;;  %v193_v5 = vcombine.low %v874_v2, %v874_v2  ;;  %vm752_vm0 = vmmov 0   ;;  %v302_v7 = vld [vmem:[%s969_s2] sm:$0xff] }
  0x36   : > { %259 = vrot.lane.b32.xlu1 %v872_v1, %s745_s30  ;;  %283 = vrot.lane.b32.xlu0 %v872_v1, %s746_s4  ;;  %s748_s6 = smov 109   ;;  %s749_s7 = smov 108   ;;  %v753_v6 = vmov 0   ;;  %vm288_vm1 = vcmask 1043456   ;;  %vm285_vm2 = vcmask 736256   ;;  %vm273_vm3 = vcmask 744448  }
  0x37   : > { %s750_s9 = smov 126   ;;  %s751_s10 = smov 110   ;;  %580 = vmatprep.mubr.msk.f32.mxu1 %vm752_vm0, %v744_v0  ;;  %645 = vset.pattern.permute.xlu0 %v753_v6  ;;  %vm261_vm4 = vcmask 752640   ;;  %vm237_vm5 = vcmask 891904   ;;  %vm249_vm6 = vcmask 883712   ;;  %vm213_vm7 = vcmask 1031168  }
  0x38   : > { %s754_s11 = smov 127   ;;  %vm225_vm8 = vcmask 900096   ;;  %vm201_vm9 = vcmask 1039360   ;;  %v301_v55 = vld [vmem:[%s968_s1] sm:$0xff]  ;;  %vm308_vm10 = vcmask 293888   ;;  %s586_s26 = smul.u32 24, %s862_s28 }
  0x39   : > { %vm464_vm11 = vcmask 261120   ;;  %s587_s27 = smul.u32 384, %s797_s16  ;;  %p980_p12 = scmp.ne.s32.totalorder %s974_s23, 0 }
  0x3a   : > { %269 = vrot.lane.b32.xlu0 %v874_v2, %s747_s22  ;;  %257 = vrot.lane.b32.xlu1 %v880_v3, %s745_s30  ;;  %s186_s29 = scalar_lea.vmem [#allocation5], %s586_s26  ;;  %s755_s16 = smov [#allocation5]  }
  0x3b   : > { %s481_s5 = sshll.u32 %s186_s29, 4  ;;  %s482_s5 = int_to_ptr.vmem [resolvable:$true] %s481_s5 }
  0x3e   : > { %271 = vrot.lane.b32.xlu1 %v194_v4, %s747_s22  ;;  %281 = vrot.lane.b32.xlu0 %v880_v3, %s746_s4 }
  0x42   : > { %255 = vrot.lane.b32.xlu1 %v874_v2, %s745_s30  ;;  %279 = vrot.lane.b32.xlu0 %v874_v2, %s746_s4  ;;  %s479_s4 = scalar_lea.hbm %s970_s3, %s587_s27 }
  0x46   : > { %233 = vrot.lane.b32.xlu1 %v880_v3, %s748_s6  ;;  %267 = vrot.lane.b32.xlu0 %v193_v5, %s747_s22  ;;  %s467_s22 = scalar_lea.sflag [#allocation4], %s862_s28 }
  0x4a   : > { %245 = vrot.lane.b32.xlu1 %v874_v2, %s749_s7  ;;  %235 = vrot.lane.b32.xlu0 %v872_v1, %s748_s6 }
  0x4e   : > { %231 = vrot.lane.b32.xlu1 %v874_v2, %s748_s6  ;;  %247 = vrot.lane.b32.xlu0 %v194_v4, %s749_s7  ;;  %s677_s6 = scalar_lea.vmem %s482_s5, 384 }
  0x4f   : > { %p678_p11 = scmp.ne.s32.totalorder %s482_s5, %s677_s6 }
  0x51   : > { %p679_p13 = pnand %p678_p11, %p980_p12 }
  0x52   : > { %209 = vrot.lane.b32.xlu1 %v880_v3, %s750_s9  ;;  %243 = vrot.lane.b32.xlu0 %v193_v5, %s749_s7  ;;  %s681_s7 = sshll.u32 %s755_s16, 4  ;;  %s682_s7 = int_to_ptr.vmem [resolvable:$false] %s681_s7 }
  0x53   : > { %p680_p0 = pneg %p679_p13  ;;  %p684_p1 = scmp.lt.s32.totalorder %s482_s5, %s682_s7 }
  0x56   : > { %221 = vrot.lane.b32.xlu1 %v874_v2, %s751_s10  ;;  %211 = vrot.lane.b32.xlu0 %v872_v1, %s750_s9 }
  0x5a   : > { %207 = vrot.lane.b32.xlu1 %v874_v2, %s750_s9  ;;  %223 = vrot.lane.b32.xlu0 %v194_v4, %s751_s10  ;;  %s683_s9 = scalar_lea.vmem %s682_s7, 768 }
  0x5b   : > { %p685_p3 = scmp.lt.s32.totalorder %s683_s9, %s677_s6 }
  0x5d   : > { %p686_p8 = por %p685_p3, %p684_p1 }
  0x5e   : > { %197 = vrot.lane.b32.xlu1 %v874_v2, %s754_s11  ;;  %219 = vrot.lane.b32.xlu0 %v193_v5, %s751_s10 }
  0x5f   : > { %p687_p10 = pnand %p686_p8, %p680_p0 }
  0x62   : > { %195 = vrot.lane.b32.xlu1 %v193_v5, %s754_s11  ;;  %199 = vrot.lane.b32.xlu0 %v194_v4, %s754_s11 }
  0x66   : > { %305 = vperm.xlu0 %645, %v302_v7  }
  0xa8   : > { %v260_v8 = vpop.permute.xlu1 %259  ;;  %v284_v9 = vpop.permute.xlu0 %283 }
  0xa9   : > { %571 = vmatpush3.msk.msra.mxu1 %vm288_vm1, %v284_v9 }
  0xaa   : > { %572 = vmatprep.subr.mxu1 %v744_v0 }
  0xac   : > { %v270_v10 = vpop.permute.xlu0 %269  ;;  %v258_v11 = vpop.permute.xlu1 %257 }
  0xad   : > { %v263_v19 = vsel %vm261_vm4, %v258_v11, %v260_v8 }
  0xb0   : > { %v272_v12 = vpop.permute.xlu1 %271  ;;  %v282_v13 = vpop.permute.xlu0 %281 }
  0xb1   : > { %v287_v14 = vsel %vm285_vm2, %v282_v13, %v284_v9  ;;  %v300_v15 = vsel %vm288_vm1, %v260_v8, %v272_v12  ;;  %v275_v16 = vsel %vm273_vm3, %v270_v10, %v272_v12 }
  0xb2   : > { %556 = vmatprep.subr.msk.mxu0 %vm288_vm1, %v287_v14  ;;  %573 = vmatpush3.msra.mxu1 %v300_v15  ;;  %v299_v21 = vsel %vm288_vm1, %v263_v19, %v275_v16 }
  0xb3   : > { %574 = vmatprep.subr.mxu1 %v744_v0 }
  0xb4   : > { %v256_v17 = vpop.permute.xlu1 %255  ;;  %v280_v18 = vpop.permute.xlu0 %279 }
  0xb5   : > { %v286_v20 = vsel %vm285_vm2, %v280_v18, %v282_v13  ;;  %v262_v24 = vsel %vm261_vm4, %v256_v17, %v258_v11 }
  0xb6   : > { %557 = vmatpush1.msk.msra.mxu0 %vm288_vm1, %v286_v20 }
  0xb7   : > { %342 = vmatprep.subr.mxu0 %v299_v21 }
  0xb8   : > { %v234_v22 = vpop.permute.xlu1 %233  ;;  %v268_v23 = vpop.permute.xlu0 %267 }
  0xb9   : > { %v274_v25 = vsel %vm273_vm3, %v268_v23, %v270_v10 }
  0xba   : > { %v298_v26 = vsel %vm288_vm1, %v262_v24, %v274_v25 }
  0xbb   : > { %343 = vmatpush1.msra.mxu0 %v298_v26 }
  0xbc   : > { %v246_v27 = vpop.permute.xlu1 %245  ;;  %v236_v28 = vpop.permute.xlu0 %235 }
  0xbd   : > { %v239_v31 = vsel %vm237_vm5, %v234_v22, %v236_v28 }
  0xc0   : > { %v232_v29 = vpop.permute.xlu1 %231  ;;  %v248_v30 = vpop.permute.xlu0 %247 }
  0xc1   : > { %v251_v32 = vsel %vm249_vm6, %v246_v27, %v248_v30  ;;  %v297_v33 = vsel %vm288_vm1, %v236_v28, %v248_v30  ;;  %v238_v37 = vsel %vm237_vm5, %v232_v29, %v234_v22 }
  0xc2   : > { %575 = vmatpush3.msra.mxu1 %v297_v33  ;;  %v296_v34 = vsel %vm288_vm1, %v239_v31, %v251_v32 }
  0xc3   : > { %344 = vmatprep.subr.mxu0 %v296_v34  ;;  %576 = vmatprep.subr.mxu1 %v744_v0 }
  0xc4   : > { %v210_v35 = vpop.permute.xlu1 %209  ;;  %v244_v36 = vpop.permute.xlu0 %243 }
  0xc5   : > { %v250_v38 = vsel %vm249_vm6, %v244_v36, %v246_v27 }
  0xc6   : > { %v295_v39 = vsel %vm288_vm1, %v238_v37, %v250_v38 }
  0xc7   : > { %345 = vmatpush1.msra.mxu0 %v295_v39 }
  0xc8   : > { %v222_v40 = vpop.permute.xlu1 %221  ;;  %v212_v41 = vpop.permute.xlu0 %211 }
  0xc9   : > { %v215_v44 = vsel %vm213_vm7, %v210_v35, %v212_v41 }
  0xcc   : > { %v208_v42 = vpop.permute.xlu1 %207  ;;  %v224_v43 = vpop.permute.xlu0 %223 }
  0xcd   : > { %v227_v45 = vsel %vm225_vm8, %v222_v40, %v224_v43  ;;  %v294_v46 = vsel %vm288_vm1, %v212_v41, %v224_v43  ;;  %v214_v50 = vsel %vm213_vm7, %v208_v42, %v210_v35 }
  0xce   : > { %577 = vmatpush3.msra.mxu1 %v294_v46  ;;  %v293_v47 = vsel %vm288_vm1, %v215_v44, %v227_v45 }
  0xcf   : > { %346 = vmatprep.subr.mxu0 %v293_v47  ;;  %578 = vmatprep.subr.mxu1 %v744_v0 }
  0xd0   : > { %v198_v48 = vpop.permute.xlu1 %197  ;;  %v220_v49 = vpop.permute.xlu0 %219 }
  0xd1   : > { %v226_v51 = vsel %vm225_vm8, %v220_v49, %v222_v40 }
  0xd2   : > { %v292_v52 = vsel %vm288_vm1, %v214_v50, %v226_v51 }
  0xd3   : > { %347 = vmatpush1.msra.mxu0 %v292_v52 }
  0xd4   : > { %v196_v53 = vpop.permute.xlu1 %195  ;;  %v200_v54 = vpop.permute.xlu0 %199 }
  0xd5   : > { %v202_v56 = vsel %vm201_vm9, %v196_v53, %v198_v48  ;;  %v203_v57 = vsel %vm201_vm9, %v198_v48, %v200_v54  ;;  %v291_v58 = vsel %vm288_vm1, %v872_v1, %v200_v54 }
  0xd6   : > { %579 = vmatpush3.msra.mxu1 %v291_v58  ;;  %v290_v59 = vsel %vm288_vm1, %v880_v3, %v203_v57  ;;  %v289_v60 = vsel %vm288_vm1, %v874_v2, %v202_v56 }
  0xd7   : > { %348 = vmatprep.subr.mxu0 %v290_v59  ;;  %581 = vmatmul.mubr.msk.f32.vlgmr.msra.gmra.mxu1 %vm308_vm10, %v301_v55 }
  0xd8   : > { %349 = vmatpush1.msra.mxu0 %v289_v60 }
  0xd9   : > { %558 = vmatmul.mubr.msk.f32.vlgmr.msra.gmra.mxu0 %vm308_vm10, %v301_v55 }
  0xe1   : > { %v306_v62 = vpop.permute.xlu0 %305 }
 0x197   : > { %v455_v61 = vpop.f32.mrf.mxu1 }
 0x198   : > { %v456_v63 = vadd.f32 %v455_v61, %v306_v62 }
 0x199   : > { %v384_v0 = vpop.f32.mrf.mxu0  ;;  %v582_v1 = vpop.f32.mrf.mxu1 }
 0x19a   : > { %v385_v4 = vadd.f32 %v384_v0, %v306_v62  ;;  %v461_v5 = vmax.f32 %v456_v63, 0.0 }
 0x19b   : > { %v386_v3 = vpop.f32.mrf.mxu0 }
 0x19c   : > { %v459_v2 = vmax.f32 %v385_v4, 0.0  ;;  %465 = vst.msk [vmem:[%s186_s29 + $0x10] sm:$0xff] %vm464_vm11, %v461_v5  ;;  %v387_v6 = vadd.f32 %v386_v3, %v306_v62 }
 0x19e   : > { %462 = vst [vmem:[%s186_s29] sm:$0xff] %v459_v2  ;;  %v460_v7 = vmax.f32 %v387_v6, 0.0 }
 0x1a0   : > { %463 = vst [vmem:[%s186_s29 + $0x8] sm:$0xff] %v460_v7 }
 0x1a1   : > { %690 = shalt.err (!%p687_p10)
}
 0x1a2   : > { %s691_s10 = scalar_lea.hbm %s479_s4, 384  ;;  %s695_s17 = scalar_lea.hbm %s970_s3, 768 }
 0x1a3   : > { %p692_p2 = scmp.ne.s32.totalorder %s479_s4, %s691_s10  ;;  %p696_p7 = scmp.lt.s32.totalorder %s479_s4, %s970_s3 }
 0x1a4   : > { %p697_p5 = scmp.lt.s32.totalorder %s695_s17, %s691_s10 }
 0x1a5   : > { %p693_p4 = pnand %p692_p2, %p980_p12 }
 0x1a6   : > { %p698_p6 = por %p697_p5, %p696_p7 }
 0x1a7   : > { %p694_p9 = pneg %p693_p4 }
 0x1a9   : > { %p699_p11 = pnand %p698_p6, %p694_p9 }
 0x1ab   : > { %702 = shalt.err (!%p699_p11)
}
 0x1ac   : > { %590 = dma.vmem_to_hbm [thread:$0]  (%p980_p12), %s482_s5, 384, %s479_s4, %s467_s22  }
 0x1ad PF: > { %s493_s25 = sand.u32 1, %s729_s12   ;;  %p981_p13 = scmp.ne.s32.totalorder %s975_s24, 0 }
 0x1ae   : > { %p982_p0 = scmp.ge.s32.totalorder %s741_s15, 2  ;;  %s494_s26 = scalar_lea.sflag [#allocation4], %s493_s25 }
 0x1b0   : > { %p597_p1 = pnand %p982_p0, %p981_p13 }
 0x1b2   : > { %p598_p3 = pneg %p597_p1 }
 0x1b4   : > { %724 = dma.done.wait (%p598_p3), %s494_s26, 384  }
 0x1b5   : > { %726 = vsyncadd (%p598_p3), %s494_s26, 4294966912  ;;  %p16_p8 = scmp.ge.s32.totalorder %s801_s18, 4   ;;  %s983_s12 = smov %s733_s13 }
 0x1b6   : > { %s984_s13 = smov %s737_s14  ;;  %s985_s14 = smov %s813_s21 }
 0x1b7   : > { %s986_s15 = smov %s801_s18  ;;  %18 = sbr.rel (!%p16_p8) target bundleno = 5 (0x5), region = 77 }
 0x1bc   :  { %499 = vsyncpa [#allocation3], 1 }
 0x1bd   :  { %501 = vsyncpa [#allocation3 + $0x1], 1 }
 0x1be   :  { %502 = vsyncpa [#allocation4], 1 }
 0x1bf   :  { %504 = vsyncpa [#allocation4 + $0x1], 1 }

</bundles_post_ra>
